<compile_context>
chip_gen: v5e
topology: v5e:2x2
jax: 0.10.0
libtpu: 0.0.40
codegen_flags: <defaults>
</compile_context>

<pallas_src>
import jax
import jax.numpy as jnp
from jax.experimental import pallas as pl
from jax.experimental.pallas import tpu as pltpu


def _dot_product_kernel(cand_ref, user_ref, out_ref):
    # cand_ref: (TB, TC, X), user_ref: (TB, X), out_ref: (TB, TC)
    # Multiply in the input dtype; accumulate the X reduction in f32 (no
    # materialized f32 copy of the candidate tile).
    scores = jnp.sum(
        cand_ref[...] * user_ref[...][:, None, :],
        axis=-1,
        dtype=jnp.float32,
    )
    out_ref[...] = scores.astype(out_ref.dtype)


def _round_down_mult(v, m):
    return (v // m) * m


def _choose_tiles(B, C, X, itemsize, target_bytes=4 << 20):
    """Pick (tb, tc) so the candidate block is ~target_bytes of padded VMEM."""
    x_pad = -(-X // 128) * 128            # lane padding of the last dim
    row_bytes = x_pad * itemsize          # one (batch, candidate) row in VMEM

    # Candidate-dim tile: full C if a minimal (tb=8) slab fits the budget,
    # otherwise a multiple of 128 (keeps the (tb, tc) output block tile-legal).
    if C <= 128 or 8 * C * row_bytes <= target_bytes:
        tc = C
    else:
        tc = max(128, _round_down_mult(target_bytes // (8 * row_bytes), 128))
        tc = min(tc, _round_down_mult(C, 128))

    # Batch-dim tile: biggest multiple of 8 that keeps the block near target.
    tb = max(1, target_bytes // max(1, tc * row_bytes))
    tb = min(tb, B)
    if tb < B:
        tb = min(B, max(8, _round_down_mult(tb, 8)))

    # Keep at least 2 grid steps when possible so both v7x TCs get work.
    if B > 8 and (-(-B // tb)) * (-(-C // tc)) < 2:
        tb = min(tb, max(8, _round_down_mult(-(-B // 2), 8)))
    return tb, tc


def dot_product_click_predictor(candidate_news_vector, user_vector,
                                batch_tile=None, candidate_tile=None):
    """candidate_news_vector: (B, C, X); user_vector: (B, X) -> (B, C)."""
    B, C, X = candidate_news_vector.shape
    assert user_vector.shape == (B, X)

    out_dtype = candidate_news_vector.dtype
    itemsize = candidate_news_vector.dtype.itemsize

    tb, tc = _choose_tiles(B, C, X, itemsize)
    if batch_tile is not None:
        tb = min(batch_tile, B)
        if tb < B:                         # keep (8,128) sublane rule legal
            tb = min(B, max(8, _round_down_mult(tb, 8)))
    if candidate_tile is not None:
        tc = min(candidate_tile, C)
        if tc < C:                         # lane rule for the (tb, tc) out block
            tc = min(C, max(128, _round_down_mult(tc, 128)))

    grid = (pl.cdiv(B, tb), pl.cdiv(C, tc))

    cost = pl.CostEstimate(
        flops=2 * B * C * X,
        transcendentals=0,
        bytes_accessed=itemsize * (B * C * X + B * X) + out_dtype.itemsize * B * C,
    )

    out = pl.pallas_call(
        _dot_product_kernel,
        out_shape=jax.ShapeDtypeStruct((B, C), out_dtype),
        grid_spec=pltpu.PrefetchScalarGridSpec(
            num_scalar_prefetch=0,
            grid=grid,
            in_specs=[
                pl.BlockSpec((tb, tc, X), lambda b, c: (b, c, 0)),
                pl.BlockSpec((tb, X), lambda b, c: (b, 0)),
            ],
            out_specs=pl.BlockSpec((tb, tc), lambda b, c: (b, c)),
        ),
        compiler_params=pltpu.CompilerParams(
            dimension_semantics=("parallel", "parallel"),
            # Above v5e/v6e scoped defaults (16/32 MiB), below v7x's 64 MiB
            # physical VMEM even with double-buffered inputs.
            vmem_limit_bytes=48 << 20,
        ),
        cost_estimate=cost,
    )(candidate_news_vector, user_vector)

    return out


if __name__ == "__main__":
    key = jax.random.PRNGKey(0)
    k1, k2, k3, k4 = jax.random.split(key, 4)

    # Primary test: small shapes consistent with the forward (batch=2, candidate=8, X=32).
    B, C, X = 2, 8, 32
    candidate_news_vector = jax.random.normal(k1, (B, C, X), dtype=jnp.float32)
    user_vector = jax.random.normal(k2, (B, X), dtype=jnp.float32)

    probability = dot_product_click_predictor(candidate_news_vector, user_vector)
    probability = jax.block_until_ready(probability)

    ref = jnp.einsum("bcx,bx->bc", candidate_news_vector, user_vector)
    assert probability.shape == (B, C)
    assert jnp.allclose(probability, ref, atol=1e-5, rtol=1e-5)

    # Secondary test: exercise the 2-D (batch, candidate) grid with partial
    # last blocks on both axes.
    B2, C2, X2 = 20, 200, 32
    cand2 = jax.random.normal(k3, (B2, C2, X2), dtype=jnp.float32)
    user2 = jax.random.normal(k4, (B2, X2), dtype=jnp.float32)
    prob2 = jax.block_until_ready(
        dot_product_click_predictor(cand2, user2, batch_tile=8, candidate_tile=128)
    )
    ref2 = jnp.einsum("bcx,bx->bc", cand2, user2)
    assert prob2.shape == (B2, C2)
    assert jnp.allclose(prob2, ref2, atol=1e-5, rtol=1e-5)

    print("KERNEL_OK")
</pallas_src>

<mosaic_0001>
module attributes {stable_mosaic.version = 11 : i64} {
  func.func @_dot_product_kernel(%arg0: i32, %arg1: i32, %arg2: memref<2x8x32xf32, #tpu.memory_space<vmem>>, %arg3: memref<2x32xf32, #tpu.memory_space<vmem>>, %arg4: memref<2x8xf32, #tpu.memory_space<vmem>>) attributes {dimension_semantics = [#tpu.dimension_semantics<parallel>, #tpu.dimension_semantics<parallel>], iteration_bounds = array<i64: 1, 1>, scalar_prefetch = 0 : i64, scratch_operands = 0 : i64, tpu.core_type = #tpu.core_type<tc>, window_params = [{transform_indices = @transform_0, window_bounds = array<i64: 2, 8, 32>}, {transform_indices = @transform_1, window_bounds = array<i64: 2, 32>}, {transform_indices = @transform_2, window_bounds = array<i64: 2, 8>}]} {
    %c0 = arith.constant 0 : index
    %c0_0 = arith.constant 0 : index
    %c0_1 = arith.constant 0 : index
    %0 = vector.load %arg2[%c0, %c0_0, %c0_1] : memref<2x8x32xf32, #tpu.memory_space<vmem>>, vector<2x8x32xf32>
    %c0_2 = arith.constant 0 : index
    %c0_3 = arith.constant 0 : index
    %1 = vector.load %arg3[%c0_2, %c0_3] : memref<2x32xf32, #tpu.memory_space<vmem>>, vector<2x32xf32>
    %2 = vector.shape_cast %1 : vector<2x32xf32> to vector<2x1x32xf32>
    %3 = vector.broadcast %2 : vector<2x1x32xf32> to vector<2x8x32xf32>
    %4 = arith.mulf %0, %3 : vector<2x8x32xf32>
    %cst = arith.constant dense<0.000000e+00> : vector<2x8xf32>
    %5 = vector.multi_reduction <add>, %4, %cst [2] : vector<2x8x32xf32> to vector<2x8xf32>
    %c0_4 = arith.constant 0 : index
    %c0_5 = arith.constant 0 : index
    %6 = vector.load %arg4[%c0_4, %c0_5] : memref<2x8xf32, #tpu.memory_space<vmem>>, vector<2x8xf32>
    tpu.vector_store %arg4[%c0_4, %c0_5], %5 {strides = array<i32>} : memref<2x8xf32, #tpu.memory_space<vmem>>, vector<2x8xf32>,
    return
  }
  func.func @transform_0(%arg0: i32, %arg1: i32) -> (i32, i32, i32) {
    %c0_i32 = arith.constant 0 : i32
    %c0_i32_0 = arith.constant 0 : i32
    return %arg0, %arg1, %c0_i32 : i32, i32, i32
  }
  func.func @transform_1(%arg0: i32, %arg1: i32) -> (i32, i32) {
    %c0_i32 = arith.constant 0 : i32
    %c0_i32_0 = arith.constant 0 : i32
    return %arg0, %c0_i32 : i32, i32
  }
  func.func @transform_2(%arg0: i32, %arg1: i32) -> (i32, i32) {
    %c0_i32 = arith.constant 0 : i32
    return %arg0, %arg1 : i32, i32
  }
}

</mosaic_0001>

<bundles_post_ra>
// kernel: tpu_custom_call.1
= control target key start
LH: loop header
LB: loop body
LE: loop exit
PB: predicated region body
PF: predicated region fallthrough
CT: control target
= control target key end

     0   :  { %7 = vsyncpa [#allocation3], 0  ;;  %s201_s0 = inlined_call_operand.hbm [shape: f32[2,8,32], index: 0, kind: input, shape index: {}]   ;;  %s202_s1 = inlined_call_operand.hbm [shape: f32[2,32], index: 1, kind: input, shape index: {}]   ;;  %s203_s2 = inlined_call_operand.hbm [shape: f32[2,8], index: 2, kind: output, shape index: {}]  }
   0x1   :  { %8 = vsyncpa [#allocation6], 0 }
   0x2   :  { %9 = vsyncpa [#allocation4], 0  ;;  %s14_s11 = sshll.u32 %s201_s0, 4  ;;  %s172_s12 = smov [#allocation2]   ;;  %s15_s11 = int_to_ptr.hbm [resolvable:$true] %s14_s11 }
   0x3   :  { %s16_s13 = sshll.u32 %s172_s12, 4  ;;  %s28_s16 = sshll.u32 %s202_s1, 4  ;;  %s17_s13 = int_to_ptr.vmem [resolvable:$true] %s16_s13  ;;  %s29_s16 = int_to_ptr.hbm [resolvable:$true] %s28_s16 }
   0x4   :  { %s173_s17 = smov 128   ;;  %s174_s18 = smov 8  }
   0x5   :  { %22 = dma.hbm_to_vmem [thread:$0]  %s15_s11, 256, %s17_s13, [#allocation3], %s173_s17, %s173_s17, %s174_s18  }
   0x6   :  { %s175_s19 = smov [#allocation5]  }
   0x7   :  { %s30_s20 = sshll.u32 %s175_s19, 4  ;;  %s31_s20 = int_to_ptr.vmem [resolvable:$true] %s30_s20 }
   0x8   :  { %33 = dma.hbm_to_vmem [thread:$0]  %s29_s16, 32, %s31_s20, [#allocation6]  }
   0x9   :  { %166 = dma.done.wait [#allocation3], 256  }
   0xa   :  { %167 = vsyncadd [#allocation3], 4294967040 }
   0xb   :  { %168 = dma.done.wait [#allocation6], 32  }
   0xc   :  { %169 = vsyncadd [#allocation6], 4294967264  ;;  %v42_v0 = vld [vmem:[#allocation2] sm:$0xff]  ;;  %v44_v1 = vld [vmem:[#allocation5] sm:$0x3]  ;;  %vm53_vm0 = vcmask 261120   ;;  %v62_v11 = vlaneseq }
   0xd   :  { %v47_v2 = vperm.slane %v44_v1, 0  ;;  %v46_v3 = vrot.slane %v44_v1, 1  ;;  %v43_v6 = vld [vmem:[#allocation2 + $0x8] sm:$0xff]  ;;  %s176_s0 = smov [#allocation7]   ;;  %s78_s23 = sshll.u32 %s203_s2, 4  ;;  %vm66_vm1 = vcmask 1041409   ;;  %s79_s23 = int_to_ptr.hbm [resolvable:$true] %s78_s23 }
   0xe   :  { %v63_v12 = vand.u32 127, %v62_v11  ;;  %s76_s1 = sshll.u32 %s176_s0, 4  ;;  %vm69_vm2 = vcmask 58368   ;;  %s77_s1 = int_to_ptr.vmem [resolvable:$true] %s76_s1 }
   0xf   :  { %v51_v4 = vmul.f32 %v47_v2, %v42_v0  ;;  %v48_v5 = vperm.slane %v46_v3, 0 }
  0x11   :  { %v54_v7 = vsel %vm53_vm0, %v51_v4, 0.0  ;;  %v52_v8 = vmul.f32 %v48_v5, %v43_v6 }
  0x12   :  { %55 = vadd.xlane.f32.xlu0 %v54_v7 }
  0x13   :  { %v57_v9 = vsel %vm53_vm0, %v52_v8, 0.0 }
  0x1a   :  { %58 = vadd.xlane.f32.xlu0 %v57_v9 }
  0x85   :  { %v56_v10 = vpop.xlane.xlu0 %55 }
  0x86   :  { %v64_v14 = vperm.slane %v56_v10, %v63_v12 }
  0x8d   :  { %v59_v13 = vpop.xlane.xlu0 %58 }
  0x8e   :  { %v65_v15 = vperm.slane %v59_v13, %v63_v12 }
  0x90   :  { %v67_v16 = vsel %vm66_vm1, %v65_v15, %v64_v14 }
  0x91   :  { %70 = vst.msk [vmem:[#allocation7] sm:$0x3] %vm69_vm2, %v67_v16 }
  0x92   :  { %81 = dma.vmem_to_hbm [thread:$0]  %s77_s1, 32, %s79_s23, [#allocation4]  }
  0x93   :  { %170 = dma.done.wait [#allocation4], 32  }
  0x94   :  { %171 = vsyncadd [#allocation4], 4294967264 }
  0x95   :  { %86 = vsyncpa [#allocation3], 1 }
  0x96   :  { %87 = vsyncpa [#allocation6], 1 }
  0x97   :  { %88 = vsyncpa [#allocation4], 1 }

</bundles_post_ra>
